<compile_context>
chip_gen: v7x
topology: tpu7x:2x2x1
jax: 0.10.0
libtpu: 0.0.40
codegen_flags: <defaults>
</compile_context>

<pallas_src>
import functools

import jax
import jax.numpy as jnp
from jax import lax
from jax.experimental import pallas as pl
from jax.experimental.pallas import tpu as pltpu

GAMMA = 2.0
ALPHA = (2.0, 1.0)                           # alpha[0] for target==0, alpha[1] for target==1
EPS = float(jnp.finfo(jnp.float32).eps)      # matches torch.finfo().eps (float32 default)

LANES = 128
SUBLANES = 8        # f32 sublane tile (output partials)
ROW_ALIGN = 16      # bf16 sublane tile (alpha stream) -> keep row counts 16-aligned
CHUNK_ROWS = 128    # inner-loop chunk; bounds vreg live ranges

# Sentinel padding: alpha=1 (i.e. target==1) and d=+100 give p_t == 1, q == 0,
# loss == 0 exactly, so padded elements never perturb the sum.
PAD_D = 100.0
PAD_ALPHA = 1.0


def _round_up(x, m):
    return ((x + m - 1) // m) * m


def _focal_loss_kernel(d_ref, a_ref, out_ref, *, chunk_rows, n_chunks):
    # d_ref  : (tile_rows, 128) f32   logit difference  l1 - l0
    # a_ref  : (tile_rows, 128) bf16  alpha in {1., 2.}  (1 iff target==1)
    # out_ref: (8, 128)         f32   per-(sublane, lane) partial sums for this tile

    def chunk_sum(c, acc):
        start = pl.multiple_of(c * chunk_rows, chunk_rows)
        d = d_ref[pl.ds(start, chunk_rows), :]
        alpha = a_ref[pl.ds(start, chunk_rows), :].astype(jnp.float32)

        sign = 3.0 - 2.0 * alpha                  # +1 if target==1 else -1   (VALU)
        z = sign * d
        # 2-class softmax prob of the target class == sigmoid(z); tanh form is a
        # single EUP push (no exp + reciprocal pair).
        p_t = 0.5 + 0.5 * jnp.tanh(0.5 * z)
        q = 1.0 - p_t
        loss = alpha * (-(q * q) * jnp.log(p_t + EPS))   # gamma == 2 -> square, not pow

        # (chunk_rows, 128) -> (8, 128) lane-dense partial sums.
        return acc + loss.reshape(chunk_rows // SUBLANES, SUBLANES, LANES).sum(axis=0)

    acc0 = jnp.zeros((SUBLANES, LANES), jnp.float32)
    if n_chunks == 1:
        out_ref[...] = chunk_sum(0, acc0)
    else:
        out_ref[...] = lax.fori_loop(0, n_chunks, chunk_sum, acc0, unroll=2)


def _pick_tiling(n, desired_tile_rows):
    num_rows = pl.cdiv(n, LANES)
    rows_a = _round_up(num_rows, ROW_ALIGN)
    # Cap the tile so the grid has >= 2 steps whenever possible (keeps both
    # v7x TensorCores busy; ~0.35 us/step overhead is negligible on v5e/v6e).
    cap = _round_up(pl.cdiv(rows_a, 2), ROW_ALIGN) if rows_a > ROW_ALIGN else ROW_ALIGN
    tile_rows = max(ROW_ALIGN, min(desired_tile_rows, cap))
    tile_rows = (tile_rows // ROW_ALIGN) * ROW_ALIGN
    if tile_rows >= CHUNK_ROWS:
        tile_rows = (tile_rows // CHUNK_ROWS) * CHUNK_ROWS
        chunk_rows = CHUNK_ROWS
    else:
        chunk_rows = tile_rows
    padded_rows = _round_up(rows_a, tile_rows)
    grid = padded_rows // tile_rows
    return tile_rows, chunk_rows, padded_rows, grid


def focal_loss(logits, targets, *, tile_rows=2048):
    """logits: (N, 2) float, targets: (N,) int -> scalar mean focal loss."""
    n = logits.shape[0]
    tile_rows, chunk_rows, padded_rows, grid = _pick_tiling(n, tile_rows)
    padded = padded_rows * LANES

    # Only the class-logit difference matters for a 2-class softmax; keep the
    # subtract + pad + reshape as one fused expression (single HBM pass).
    # TODO(synk): optional further win on v5e/v6e — feed padded (rows, 256)
    # logits and de-interleave lanes in-kernel (XLU) to skip this `d` write.
    d = jnp.pad(
        (logits[:, 1] - logits[:, 0]).astype(jnp.float32),
        (0, padded - n), constant_values=PAD_D,
    ).reshape(padded_rows, LANES)

    # Narrow alpha stream (bf16, values {1,2}); sign derived in-kernel.
    alpha = jnp.pad(
        (2 - targets).astype(jnp.bfloat16),
        (0, padded - n), constant_values=PAD_ALPHA,
    ).reshape(padded_rows, LANES)

    kernel = functools.partial(
        _focal_loss_kernel,
        chunk_rows=chunk_rows,
        n_chunks=tile_rows // chunk_rows,
    )

    partial_sums = pl.pallas_call(
        kernel,
        out_shape=jax.ShapeDtypeStruct((grid * SUBLANES, LANES), jnp.float32),
        grid=(grid,),
        in_specs=[
            pl.BlockSpec((tile_rows, LANES), lambda i: (i, 0)),
            pl.BlockSpec((tile_rows, LANES), lambda i: (i, 0)),
        ],
        out_specs=pl.BlockSpec((SUBLANES, LANES), lambda i: (i, 0)),
        compiler_params=pltpu.CompilerParams(
            dimension_semantics=("parallel",)),
    )(d, alpha)

    # Sentinel-padded elements contribute exactly 0; divide by the true N.
    return jnp.sum(partial_sums) / n


def focal_loss_ref(logits, targets):
    """Pure-JAX reference mirroring the PyTorch module (for sanity checking)."""
    probs = jax.nn.softmax(logits.astype(jnp.float32), axis=1)
    one_hot = jax.nn.one_hot(targets, 2, dtype=probs.dtype)
    p_t = jnp.sum(probs * one_hot, axis=1)
    loss = -((1.0 - p_t) ** GAMMA) * jnp.log(p_t + EPS)
    loss = jnp.where(targets == 1, ALPHA[1] * loss, ALPHA[0] * loss)
    return jnp.mean(loss)


if __name__ == "__main__":
    key = jax.random.PRNGKey(0)
    k1, k2, k3, k4, k5, k6 = jax.random.split(key, 6)

    # Case 1: ragged batch (exercises sentinel padding + 2-step parallel grid).
    n1 = 3000
    logits1 = jax.random.normal(k1, (n1, 2), dtype=jnp.float32)
    targets1 = jax.random.bernoulli(k2, 0.5, (n1,)).astype(jnp.int32)
    out1 = focal_loss(logits1, targets1)
    jax.block_until_ready(out1)
    ref1 = focal_loss_ref(logits1, targets1)
    assert jnp.allclose(out1, ref1, rtol=1e-5, atol=1e-6), (out1, ref1)

    # Case 2: exact vreg multiple.
    n2 = 4096
    logits2 = jax.random.normal(k3, (n2, 2), dtype=jnp.float32)
    targets2 = jax.random.bernoulli(k4, 0.5, (n2,)).astype(jnp.int32)
    out2 = focal_loss(logits2, targets2)
    jax.block_until_ready(out2)
    ref2 = focal_loss_ref(logits2, targets2)
    assert jnp.allclose(out2, ref2, rtol=1e-5, atol=1e-6), (out2, ref2)

    # Case 3: larger batch exercising the chunked inner fori_loop (n_chunks > 1).
    n3 = 70000
    logits3 = jax.random.normal(k5, (n3, 2), dtype=jnp.float32)
    targets3 = jax.random.bernoulli(k6, 0.5, (n3,)).astype(jnp.int32)
    out3 = focal_loss(logits3, targets3)
    jax.block_until_ready(out3)
    ref3 = focal_loss_ref(logits3, targets3)
    assert jnp.allclose(out3, ref3, rtol=1e-5, atol=1e-6), (out3, ref3)

    print("KERNEL_OK")
</pallas_src>

<mosaic_0001>
module attributes {stable_mosaic.version = 11 : i64} {
  func.func @_focal_loss_kernel(%arg0: i32, %arg1: memref<16x128xf32, #tpu.memory_space<vmem>>, %arg2: memref<16x128xbf16, #tpu.memory_space<vmem>>, %arg3: memref<8x128xf32, #tpu.memory_space<vmem>>) attributes {dimension_semantics = [#tpu.dimension_semantics<parallel>], iteration_bounds = array<i64: 2>, scalar_prefetch = 0 : i64, scratch_operands = 0 : i64, tpu.core_type = #tpu.core_type<tc>, window_params = [{transform_indices = @transform_0, window_bounds = array<i64: 16, 128>}, {transform_indices = @transform_1, window_bounds = array<i64: 16, 128>}, {transform_indices = @transform_2, window_bounds = array<i64: 8, 128>}]} {
    %cst = arith.constant 0.000000e+00 : f32
    %0 = vector.broadcast %cst : f32 to vector<8x128xf32>
    %c0_i32 = arith.constant 0 : i32
    %1 = tpu.assume_multiple %c0_i32, 16 : i32
    %2 = arith.index_cast %1 : i32 to index
    %c0 = arith.constant 0 : index
    %3 = vector.load %arg1[%2, %c0] : memref<16x128xf32, #tpu.memory_space<vmem>>, vector<16x128xf32>
    %4 = arith.index_cast %1 : i32 to index
    %c0_0 = arith.constant 0 : index
    %5 = vector.load %arg2[%4, %c0_0] : memref<16x128xbf16, #tpu.memory_space<vmem>>, vector<16x128xbf16>
    %6 = arith.extf %5 : vector<16x128xbf16> to vector<16x128xf32>
    %cst_1 = arith.constant 2.000000e+00 : f32
    %7 = vector.broadcast %cst_1 : f32 to vector<16x128xf32>
    %8 = arith.mulf %7, %6 : vector<16x128xf32>
    %cst_2 = arith.constant 3.000000e+00 : f32
    %9 = vector.broadcast %cst_2 : f32 to vector<16x128xf32>
    %10 = arith.subf %9, %8 : vector<16x128xf32>
    %11 = arith.mulf %10, %3 : vector<16x128xf32>
    %cst_3 = arith.constant 5.000000e-01 : f32
    %12 = vector.broadcast %cst_3 : f32 to vector<16x128xf32>
    %13 = arith.mulf %12, %11 : vector<16x128xf32>
    %14 = math.tanh %13 : vector<16x128xf32>
    %cst_4 = arith.constant 5.000000e-01 : f32
    %15 = vector.broadcast %cst_4 : f32 to vector<16x128xf32>
    %16 = arith.mulf %15, %14 : vector<16x128xf32>
    %cst_5 = arith.constant 5.000000e-01 : f32
    %17 = vector.broadcast %cst_5 : f32 to vector<16x128xf32>
    %18 = arith.addf %17, %16 : vector<16x128xf32>
    %cst_6 = arith.constant 1.000000e+00 : f32
    %19 = vector.broadcast %cst_6 : f32 to vector<16x128xf32>
    %20 = arith.subf %19, %18 : vector<16x128xf32>
    %21 = arith.mulf %20, %20 : vector<16x128xf32>
    %cst_7 = arith.constant 0.000000e+00 : f32
    %22 = vector.broadcast %cst_7 : f32 to vector<16x128xf32>
    %23 = arith.subf %22, %21 : vector<16x128xf32>
    %cst_8 = arith.constant 1.1920929E-7 : f32
    %24 = vector.broadcast %cst_8 : f32 to vector<16x128xf32>
    %25 = arith.addf %18, %24 : vector<16x128xf32>
    %26 = math.log %25 : vector<16x128xf32>
    %27 = arith.mulf %23, %26 : vector<16x128xf32>
    %28 = arith.mulf %6, %27 : vector<16x128xf32>
    %29 = vector.shape_cast %28 : vector<16x128xf32> to vector<2x8x128xf32>
    %cst_9 = arith.constant dense<0.000000e+00> : vector<8x128xf32>
    %30 = vector.multi_reduction <add>, %29, %cst_9 [0] : vector<2x8x128xf32> to vector<8x128xf32>
    %31 = arith.addf %0, %30 : vector<8x128xf32>
    %c0_10 = arith.constant 0 : index
    %c0_11 = arith.constant 0 : index
    %32 = vector.load %arg3[%c0_10, %c0_11] : memref<8x128xf32, #tpu.memory_space<vmem>>, vector<8x128xf32>
    tpu.vector_store %arg3[%c0_10, %c0_11], %31 {strides = array<i32>} : memref<8x128xf32, #tpu.memory_space<vmem>>, vector<8x128xf32>,
    return
  }
  func.func @transform_0(%arg0: i32) -> (i32, i32) {
    %c0_i32 = arith.constant 0 : i32
    %c0_i32_0 = arith.constant 0 : i32
    return %arg0, %c0_i32 : i32, i32
  }
  func.func @transform_1(%arg0: i32) -> (i32, i32) {
    %c0_i32 = arith.constant 0 : i32
    %c0_i32_0 = arith.constant 0 : i32
    return %arg0, %c0_i32 : i32, i32
  }
  func.func @transform_2(%arg0: i32) -> (i32, i32) {
    %c0_i32 = arith.constant 0 : i32
    %c0_i32_0 = arith.constant 0 : i32
    return %arg0, %c0_i32 : i32, i32
  }
}

</mosaic_0001>

<bundles_post_ra>
// kernel: tpu_custom_call.1
= control target key start
LH: loop header
LB: loop body
LE: loop exit
PB: predicated region body
PF: predicated region fallthrough
CT: control target
= control target key end

     0   :  { %7 = vsyncpa [#allocation3], 0  ;;  %s804_s0 = inlined_call_operand.hbm [shape: f32[32,128], index: 0, kind: input, shape index: {}]   ;;  %s805_s1 = inlined_call_operand.hbm [shape: bf16[32,128], index: 1, kind: input, shape index: {}]   ;;  %s806_s2 = inlined_call_operand.hbm [shape: f32[16,128], index: 2, kind: output, shape index: {}]  }
   0x1   :  { %9 = vsyncpa [#allocation3 + $0x1], 0 }
   0x2   :  { %10 = vsyncpa [#allocation6], 0 }
   0x3   :  { %12 = vsyncpa [#allocation6 + $0x1], 0 }
   0x4   :  { %13 = vsyncpa [#allocation4], 0 }
   0x5   :  { %15 = vsyncpa [#allocation4 + $0x1], 0  ;;  %s590_s9 = smov 0   ;;  %s592_s10 = smov 0  }
   0x6   :  { %s594_s11 = smov 0   ;;  %s596_s12 = smov 0  }
   0x7 LB: > { %s611_s13 = sadd.s32 4294967295, %s566_s12   ;;  %s350_s14 = sadd.s32 4294967294, %s566_s12   ;;  %s566_s12 = sphi %s596_s12, %s822_s12   ;;  %s562_s11 = sphi %s594_s11, %s821_s11   ;;  %s558_s10 = sphi %s592_s10, %s820_s10   ;;  %s554_s9 = sphi %s590_s9, %s819_s9  }
   0x8   : > { %s615_s15 = sadd.s32 1, %s566_s12   ;;  %s28_s16 = sadd.s32 1, %s562_s11 }
   0x9   : > { %s25_s17 = ssub.s32 %s566_s12, %s615_s15  ;;  %p35_p0 = scmp.ne.s32.totalorder %s562_s11, %s558_s10 }
   0xa   : > { %p26_p1 = scmp.eq.s32.totalorder %s25_s17, 0  ;;  %p36_p2 = scmp.eq.s32.totalorder %s566_s12, 0 }
   0xb   : > { %p41_p3 = scmp.ne.s32.totalorder %s558_s10, %s554_s9  ;;  %p42_p4 = scmp.eq.s32.totalorder %s611_s13, 0 }
   0xc   : > { %s627_s18 = scalar_select %p26_p1, %s562_s11, %s28_s16  }
   0xd   : > { %p629_p5 = por %p36_p2, %p35_p0  ;;  %p633_p6 = por %p42_p4, %p41_p3 }
   0xe   : > { %p91_p7 = scmp.eq.s32.totalorder %s611_s13, 1  ;;  %p97_p8 = scmp.eq.s32.totalorder %s350_s14, 1 }
   0xf   : > { %s810_s20 = scalar_select %p633_p6, 1, 0 }
  0x10   : > { %p390_p10 = scmp.lt.s32.totalorder %s566_s12, 2  ;;  %p640_p11 = por %p91_p7, %p35_p0 }
  0x11   : > { %p644_p12 = por %p97_p8, %p41_p3  ;;  %s649_s23 = sand.u32 1, %s562_s11  }
  0x12   : > { %s811_s21 = scalar_select %p640_p11, 1, 0 }
  0x13   : > { %s812_s22 = scalar_select %p644_p12, 1, 0 }
  0x14   : > { %s367_s24 = sshll.u32 %s566_s12, 8  ;;  %s353_s25 = sshll.u32 %s649_s23, 4 }
  0x15   : > { %s656_s28 = scalar_lea.hbm %s804_s0, %s367_s24  ;;  %s121_s29 = scalar_lea.vmem [#allocation2], %s353_s25 }
  0x16   : > { %s128_s30 = sshll.u32 %s121_s29, 4  ;;  %p660_p13 = pnand %p390_p10, %p629_p5  ;;  %s664_s30 = int_to_ptr.vmem [resolvable:$true] %s128_s30 }
  0x17   : > { %s118_s4 = scalar_lea.sflag [#allocation3], %s649_s23  ;;  %s436_s5 = scalar_lea.hbm %s656_s28, 256 }
  0x18   : > { %p437_p0 = scmp.ne.s32.totalorder %s656_s28, %s436_s5  ;;  %p438_p1 = pneg %p660_p13 }
  0x19   : > { %s441_s8 = scalar_lea.hbm %s804_s0, 512  ;;  %p442_p4 = scmp.lt.u32.totalorder %s656_s28, %s804_s0 }
  0x1a   : > { %p439_p2 = pnand %p438_p1, %p437_p0  ;;  %p443_p5 = scmp.lt.u32.totalorder %s441_s8, %s436_s5 }
  0x1b   : > { %p445_p8 = scmp.lt.u32.totalorder %s436_s5, %s656_s28 }
  0x1c   : > { %p440_p3 = pneg %p439_p2  ;;  %p444_p7 = por %p443_p5, %p442_p4 }
  0x1e   : > { %p446_p10 = por %p445_p8, %p444_p7 }
  0x20   : > { %p447_p9 = pnand %p446_p10, %p440_p3 }
  0x22   : > { %450 = shalt.err (!%p447_p9)
}
  0x23   : > { %s451_s17 = scalar_lea.vmem %s664_s30, 256  ;;  %s568_s19 = smov [#allocation2]  }
  0x24   : > { %p452_p0 = scmp.ne.s32.totalorder %s664_s30, %s451_s17  ;;  %s456_s24 = sshll.u32 %s568_s19, 4  ;;  %s457_s24 = int_to_ptr.vmem [resolvable:$false] %s456_s24 }
  0x25   : > { %s458_s25 = scalar_lea.vmem %s457_s24, 512  ;;  %p459_p11 = scmp.lt.s32.totalorder %s664_s30, %s457_s24 }
  0x26   : > { %p454_p2 = pnand %p452_p0, %p438_p1  ;;  %p460_p4 = scmp.lt.s32.totalorder %s458_s25, %s451_s17 }
  0x28   : > { %p455_p12 = pneg %p454_p2  ;;  %p461_p5 = por %p460_p4, %p459_p11 }
  0x2a   : > { %p462_p7 = pnand %p461_p5, %p455_p12 }
  0x2c   : > { %465 = shalt.err (!%p462_p7)
}
  0x2d   : > { %s569_s26 = smov 128   ;;  %s570_s27 = smov 8  }
  0x2e   : > { %382 = dma.hbm_to_vmem [thread:$0]  (!%p660_p13), %s656_s28, 256, %s664_s30, %s118_s4, %s569_s26, %s569_s26, %s570_s27  }
  0x2f   : > { %p359_p9 = scmp.ge.s32.totalorder %s566_s12, 1  ;;  %p157_p3 = scmp.lt.s32.totalorder %s566_s12, 3 }
  0x30   : > { %s356_s29 = sshll.u32 %s649_s23, 3  ;;  %s368_s6 = sshll.u32 %s566_s12, 7 }
  0x31   : > { %p697_p11 = pnand %p359_p9, %p157_p3  ;;  %s142_s7 = scalar_lea.vmem [#allocation5], %s356_s29 }
  0x32   : > { %s149_s8 = sshll.u32 %s142_s7, 4  ;;  %s705_s17 = scalar_lea.hbm %s805_s1, %s368_s6  ;;  %s707_s8 = int_to_ptr.vmem [resolvable:$true] %s149_s8 }
  0x33   : > { %s139_s28 = scalar_lea.sflag [#allocation6], %s649_s23  ;;  %s466_s30 = scalar_lea.hbm %s705_s17, 128 }
  0x34   : > { %p467_p12 = scmp.ne.s32.totalorder %s705_s17, %s466_s30  ;;  %s471_s24 = scalar_lea.hbm %s805_s1, 256 }
  0x35   : > { %p472_p0 = scmp.lt.u32.totalorder %s705_s17, %s805_s1  ;;  %p473_p2 = scmp.lt.u32.totalorder %s471_s24, %s466_s30 }
  0x36   : > { %p469_p8 = pnand %p467_p12, %p438_p1  ;;  %p475_p5 = scmp.lt.u32.totalorder %s466_s30, %s705_s17 }
  0x37   : > { %p474_p4 = por %p473_p2, %p472_p0 }
  0x38   : > { %p470_p10 = pneg %p469_p8 }
  0x39   : > { %p476_p7 = por %p475_p5, %p474_p4 }
  0x3b   : > { %p477_p9 = pnand %p476_p7, %p470_p10 }
  0x3d   : > { %480 = shalt.err (!%p477_p9)
}
  0x3e   : > { %s481_s27 = scalar_lea.vmem %s707_s8, 128  ;;  %s571_s29 = smov [#allocation5]  }
  0x3f   : > { %p482_p3 = scmp.ne.s32.totalorder %s707_s8, %s481_s27  ;;  %s486_s6 = sshll.u32 %s571_s29, 4  ;;  %s487_s6 = int_to_ptr.vmem [resolvable:$false] %s486_s6 }
  0x40   : > { %s488_s7 = scalar_lea.vmem %s487_s6, 256  ;;  %p489_p6 = scmp.lt.s32.totalorder %s707_s8, %s487_s6 }
  0x41   : > { %p484_p12 = pnand %p482_p3, %p438_p1  ;;  %p490_p0 = scmp.lt.s32.totalorder %s488_s7, %s481_s27 }
  0x43   : > { %p485_p8 = pneg %p484_p12  ;;  %p491_p2 = por %p490_p0, %p489_p6 }
  0x45   : > { %p492_p4 = pnand %p491_p2, %p485_p8 }
  0x47   : > { %495 = shalt.err (!%p492_p4)
}
  0x48   : > { %s572_s14 = smov 64   ;;  %s573_s16 = smov 4  }
  0x49   : > { %385 = dma.hbm_to_vmem [thread:$0]  (!%p660_p13), %s705_s17, 128, %s707_s8, %s139_s28, %s572_s14, %s572_s14, %s573_s16  }
  0x4a   : > { %161 = sbr.rel (%p697_p11) target bundleno = 147 (0x93), region = 28  ;;  %s738_s30 = sand.u32 (!%p697_p11), 1, %s558_s10  }
  0x4b   : > { %s360_s4 = sshll.u32 (!%p697_p11), %s738_s30, 4  ;;  %s164_s19 = scalar_lea.sflag (!%p697_p11), [#allocation3], %s738_s30 }
  0x4c   : > { %s167_s24 = scalar_lea.vmem (!%p697_p11), [#allocation2], %s360_s4  ;;  %p815_p6 = scmp.ne.s32.totalorder (!%p697_p11), %s810_s20, 0 }
  0x51   : > { %541 = dma.done.wait (%p815_p6), %s164_s19, 256  }
  0x52   : > { %543 = vsyncadd (%p815_p6), %s164_s19, 4294967040  ;;  %s361_s23 = sshll.u32 %s738_s30, 3  ;;  %s173_s3 = scalar_lea.sflag [#allocation6], %s738_s30 }
  0x53   : > { %s176_s5 = scalar_lea.vmem [#allocation5], %s361_s23 }
  0x54   : > { %545 = dma.done.wait (%p815_p6), %s173_s3, 128  }
  0x55   : > { %547 = vsyncadd (%p815_p6), %s173_s3, 4294967168  ;;  %v370_v0 = vld [vmem:[%s176_s5] sm:$0xff]   ;;  %v205_v6 = vld [vmem:[%s167_s24 + $0x8] sm:$0xff]  ;;  %s201_s20 = scalar_lea.vmem [#allocation7], %s361_s23  ;;  %s364_s17 = sshll.u32 %s611_s13, 7 }
  0x56   : > { %v371_v1 = vunpack.c.l.bf16 %v370_v0  ;;  %v372_v2 = vunpack.c.h.bf16 %v370_v0  ;;  %v204_v5 = vld [vmem:[%s167_s24] sm:$0xff]  ;;  %s257_s8 = sshll.u32 %s201_s20, 4  ;;  %s762_s26 = scalar_lea.hbm %s806_s2, %s364_s17  ;;  %s757_s8 = int_to_ptr.vmem [resolvable:$true] %s257_s8 }
  0x57   : > { %s244_s27 = scalar_lea.sflag [#allocation4], %s738_s30  ;;  %s496_s29 = scalar_lea.vmem %s757_s8, 128 }
  0x58   : > { %v210_v3 = vmul.f32 2.0, %v371_v1  ;;  %v211_v4 = vmul.f32 2.0, %v372_v2  ;;  %p497_p13 = scmp.ne.s32.totalorder %s757_s8, %s496_s29  ;;  %p816_p1 = scmp.ne.s32.totalorder %s811_s21, 0 }
  0x59   : > { %s574_s13 = smov [#allocation7]  }
  0x5a   : > { %v212_v7 = vsub.f32 3.0, %v210_v3  ;;  %v213_v8 = vsub.f32 3.0, %v211_v4  ;;  %p498_p11 = pnand %p497_p13, %p816_p1  ;;  %s500_s6 = sshll.u32 %s574_s13, 4  ;;  %s501_s6 = int_to_ptr.vmem [resolvable:$false] %s500_s6 }
  0x5b   : > { %s502_s7 = scalar_lea.vmem %s501_s6, 256  ;;  %p503_p5 = scmp.lt.s32.totalorder %s757_s8, %s501_s6 }
  0x5c   : > { %v214_v9 = vmul.f32 %v212_v7, %v204_v5  ;;  %v215_v10 = vmul.f32 %v213_v8, %v205_v6  ;;  %p499_p10 = pneg %p498_p11  ;;  %p504_p7 = scmp.lt.s32.totalorder %s502_s7, %s496_s29 }
  0x5e   : > { %v216_v11 = vmul.f32 0.5, %v214_v9  ;;  %v217_v12 = vmul.f32 0.5, %v215_v10  ;;  %p505_p9 = por %p504_p7, %p503_p5 }
  0x60   : > { %428 = vtanh.f32 %v216_v11  ;;  %p506_p3 = pnand %p505_p9, %p499_p10 }
  0x61   : > { %430 = vtanh.f32 %v217_v12 }
  0x6a   : > { %v429_v13 = vpop.eup %428 }
  0x6b   : > { %v431_v14 = vpop.eup %430  ;;  %v220_v15 = vmul.f32 0.5, %v429_v13 }
  0x6c   : > { %v221_v16 = vmul.f32 0.5, %v431_v14 }
  0x6d   : > { %v222_v17 = vadd.f32 0.5, %v220_v15 }
  0x6e   : > { %v223_v18 = vadd.f32 0.5, %v221_v16 }
  0x6f   : > { %v230_v19 = vadd.f32 1.1920929e-07, %v222_v17  ;;  %v224_v21 = vsub.f32 1.0, %v222_v17 }
  0x70   : > { %v231_v20 = vadd.f32 1.1920929e-07, %v223_v18  ;;  %v225_v22 = vsub.f32 1.0, %v223_v18 }
  0x71   : > { %432 = vlog2.f32 %v230_v19  ;;  %v226_v23 = vmul.f32 %v224_v21, %v224_v21 }
  0x72   : > { %434 = vlog2.f32 %v231_v20  ;;  %v227_v24 = vmul.f32 %v225_v22, %v225_v22 }
  0x73   : > { %v228_v25 = vsub.f32 0.0, %v226_v23 }
  0x74   : > { %v229_v27 = vsub.f32 0.0, %v227_v24 }
  0x7b   : > { %v433_v26 = vpop.eup %432 }
  0x7c   : > { %v435_v28 = vpop.eup %434  ;;  %v233_v29 = vmul.f32 0.6931472, %v433_v26 }
  0x7d   : > { %v235_v30 = vmul.f32 0.6931472, %v435_v28 }
  0x7e   : > { %v236_v31 = vmul.f32 %v233_v29, %v228_v25 }
  0x7f   : > { %v237_v32 = vmul.f32 %v235_v30, %v229_v27 }
  0x80   : > { %v238_v33 = vmul.f32 %v371_v1, %v236_v31 }
  0x81   : > { %v239_v34 = vmul.f32 %v372_v2, %v237_v32 }
  0x83   : > { %v240_v35 = vadd.f32 %v239_v34, %v238_v33 }
  0x85   : > { %242 = vst [vmem:[%s201_s20] sm:$0xff] %v240_v35 }
  0x86   : > { %509 = shalt.err (!%p506_p3)
}
  0x87   : > { %s510_s14 = scalar_lea.hbm %s762_s26, 128  ;;  %s514_s4 = scalar_lea.hbm %s806_s2, 256 }
  0x88   : > { %p511_p12 = scmp.ne.s32.totalorder %s762_s26, %s510_s14  ;;  %p515_p2 = scmp.lt.u32.totalorder %s762_s26, %s806_s2 }
  0x89   : > { %p516_p4 = scmp.lt.u32.totalorder %s514_s4, %s510_s14  ;;  %p518_p13 = scmp.lt.u32.totalorder %s510_s14, %s762_s26 }
  0x8a   : > { %p512_p8 = pnand %p511_p12, %p816_p1 }
  0x8b   : > { %p517_p6 = por %p516_p4, %p515_p2 }
  0x8c   : > { %p513_p0 = pneg %p512_p8 }
  0x8d   : > { %p519_p11 = por %p518_p13, %p517_p6 }
  0x8f   : > { %p520_p10 = pnand %p519_p11, %p513_p0 }
  0x91   : > { %523 = shalt.err (!%p520_p10)
}
  0x92   : > { %377 = dma.vmem_to_hbm [thread:$0]  (%p816_p1), %s757_s8, 128, %s762_s26, %s244_s27  }
  0x93 PF: > { %s269_s23 = sand.u32 1, %s554_s9   ;;  %p817_p5 = scmp.ne.s32.totalorder %s812_s22, 0 }
  0x94   : > { %p818_p7 = scmp.ge.s32.totalorder %s566_s12, 2  ;;  %s270_s3 = scalar_lea.sflag [#allocation4], %s269_s23 }
  0x96   : > { %p387_p9 = pnand %p818_p7, %p817_p5 }
  0x98   : > { %549 = dma.done.wait (!%p387_p9), %s270_s3, 128  }
  0x99   : > { %551 = vsyncadd (!%p387_p9), %s270_s3, 4294967168  ;;  %p18_p3 = scmp.ge.s32.totalorder %s615_s15, 4   ;;  %s819_s9 = smov %s558_s10 }
  0x9a   : > { %s820_s10 = smov %s562_s11  ;;  %s821_s11 = smov %s627_s18 }
  0x9b   : > { %s822_s12 = smov %s615_s15  ;;  %20 = sbr.rel (!%p18_p3) target bundleno = 7 (0x7), region = 86 }
  0xa2   :  { %275 = vsyncpa [#allocation3], 1 }
  0xa3   :  { %277 = vsyncpa [#allocation3 + $0x1], 1 }
  0xa4   :  { %278 = vsyncpa [#allocation6], 1 }
  0xa5   :  { %280 = vsyncpa [#allocation6 + $0x1], 1 }
  0xa6   :  { %281 = vsyncpa [#allocation4], 1 }
  0xa7   :  { %283 = vsyncpa [#allocation4 + $0x1], 1 }

</bundles_post_ra>
